<compile_context>
chip_gen: v5e
topology: v5e:2x2
jax: 0.10.0
libtpu: 0.0.40
codegen_flags: <defaults>
</compile_context>

<pallas_src>
import functools

import jax
import jax.numpy as jnp
from jax import lax
from jax.experimental import pallas as pl
from jax.experimental.pallas import tpu as pltpu


def _gcn_pool_kernel(num_layers, hidden, batch_ref, x_ref, inv_ref, *rest):
    """rest = (w0, b0, w1, b1, ..., w_{L-1}, b_{L-1}, out_ref, acc_ref)."""
    wb_refs = rest[: 2 * num_layers]
    out_ref = rest[2 * num_layers]
    acc_ref = rest[2 * num_layers + 1]

    n = pl.program_id(0)
    num_graphs = acc_ref.shape[0]

    @pl.when(n == 0)
    def _init():
        acc_ref[...] = jnp.zeros_like(acc_ref)

    # Build the (G, TN) one-hot assignment for this node tile on the fly from
    # the int32 graph ids. Padded nodes carry id == num_graphs -> all-zero row.
    ids = batch_ref[0]                                     # (1, TN) int32
    tile_nodes = ids.shape[1]
    onehot = (lax.broadcasted_iota(jnp.int32, (num_graphs, tile_nodes), 0)
              == ids).astype(jnp.float32)                  # (G, TN)

    # Per-graph partial sums of the *input* features only (linearity trick:
    # pooling commutes with the activation-free Linear layers).
    acc_ref[...] += jnp.dot(onehot, x_ref[...],
                            preferred_element_type=jnp.float32)

    @pl.when(n == pl.num_programs(0) - 1)
    def _finalize():
        g = acc_ref[...] * inv_ref[...]                    # mean_pool(x): (G, D_in)
        # g_i = g_{i-1} @ W_i + b_i  ==  mean_pool(Linear_i(...)), exact
        # because the reference forward never applies activation / BatchNorm.
        for i in range(num_layers):
            w = wb_refs[2 * i][...]                        # (D_prev, H)
            b = wb_refs[2 * i + 1][...]                    # (1, H)
            g = jnp.dot(g, w, preferred_element_type=jnp.float32) + b
            out_ref[:, i * hidden:(i + 1) * hidden] = g    # direct slab write


def simplified_gcn_forward(x, batch, weights, biases, num_graphs,
                           readout="mean", node_tile=512):
    """x: (N, D_in) float, batch: (N,) int32 graph ids in [0, num_graphs).

    weights[i]: (D_in_or_H, H)  (transpose of PyTorch's (out, in));
    biases[i]:  (H,).
    """
    # TODO(synk): 'max' readout needs a masked segment-max (not linear); 'sum'
    # readout needs count-scaled biases. Only 'mean' is implemented here.
    assert readout == "mean"

    num_layers = len(weights)
    hidden = int(weights[0].shape[1])
    n_nodes, in_dim = x.shape

    # Node tile: multiple of 8 sublanes, capped near N.  (For very large N on
    # v7x, halve this vs v6e to respect the 64 MiB VMEM budget.)
    node_tile = max(8, (min(int(node_tile), n_nodes + 7) // 8) * 8)
    n_pad = ((n_nodes + node_tile - 1) // node_tile) * node_tile
    num_tiles = n_pad // node_tile

    # --- plain-JAX glue (tiny, O(N)) ---------------------------------------
    x_pad = jnp.pad(x.astype(jnp.float32), ((0, n_pad - n_nodes), (0, 0)))
    batch = batch.astype(jnp.int32)
    batch_pad = jnp.pad(batch, (0, n_pad - n_nodes),
                        constant_values=num_graphs)        # sentinel id
    batch_tiles = batch_pad.reshape(num_tiles, 1, node_tile)

    counts = jax.ops.segment_sum(jnp.ones((n_nodes,), jnp.float32), batch,
                                 num_segments=num_graphs)
    inv_cnt = (1.0 / jnp.maximum(counts, 1.0)).reshape(num_graphs, 1)

    # --- specs ---------------------------------------------------------------
    in_specs = [
        pl.BlockSpec((1, 1, node_tile), lambda n: (n, 0, 0)),      # graph ids
        pl.BlockSpec((node_tile, in_dim), lambda n: (n, 0)),       # x tiles
        pl.BlockSpec((num_graphs, 1), lambda n: (0, 0)),           # 1/counts
    ]
    args = [batch_tiles, x_pad, inv_cnt]
    for w, b in zip(weights, biases):
        in_specs.append(pl.BlockSpec(w.shape, lambda n: (0, 0)))   # resident W
        in_specs.append(pl.BlockSpec((1, hidden), lambda n: (0, 0)))
        args.append(w.astype(jnp.float32))
        args.append(b.reshape(1, hidden).astype(jnp.float32))

    out_shape = jax.ShapeDtypeStruct((num_graphs, num_layers * hidden),
                                     jnp.float32)
    out_specs = pl.BlockSpec((num_graphs, num_layers * hidden),
                             lambda n: (0, 0))

    kernel = functools.partial(_gcn_pool_kernel, num_layers, hidden)
    return pl.pallas_call(
        kernel,
        out_shape=out_shape,
        grid_spec=pltpu.PrefetchScalarGridSpec(
            num_scalar_prefetch=0,
            grid=(num_tiles,),
            in_specs=in_specs,
            out_specs=out_specs,
            scratch_shapes=[pltpu.VMEM((num_graphs, in_dim), jnp.float32)],
        ),
        compiler_params=pltpu.CompilerParams(
            # single node-tile axis is a reduction into the pool accumulator
            dimension_semantics=("arbitrary",),
        ),
    )(*args)


def _reference_forward(x, batch, weights, biases, num_graphs):
    """Pure-JAX reference matching the PyTorch forward (readout='mean')."""
    z = x
    gs = []
    cnts = jax.ops.segment_sum(jnp.ones((x.shape[0],)), batch,
                               num_segments=num_graphs)
    for w, b in zip(weights, biases):
        z = z @ w + b
        sums = jax.ops.segment_sum(z, batch, num_segments=num_graphs)
        gs.append(sums / jnp.maximum(cnts, 1.0)[:, None])
    return jnp.concatenate(gs, axis=1)


if __name__ == "__main__":
    # Small, deterministic problem: 16 nodes split across 2 graphs,
    # input_dim=8, hidden_dim=32, num_gc_layers=3, readout='mean'.
    N, INPUT_DIM, HIDDEN_DIM, NUM_LAYERS, NUM_GRAPHS = 16, 8, 32, 3, 2

    key = jax.random.PRNGKey(0)
    kx, *kws = jax.random.split(key, 1 + 2 * NUM_LAYERS)

    x = jax.random.normal(kx, (N, INPUT_DIM), dtype=jnp.float32)
    batch = jnp.array([0] * (N // 2) + [1] * (N // 2), dtype=jnp.int32)

    weights, biases = [], []
    in_dim = INPUT_DIM
    for i in range(NUM_LAYERS):
        w = 0.1 * jax.random.normal(kws[2 * i], (in_dim, HIDDEN_DIM),
                                    dtype=jnp.float32)
        b = 0.1 * jax.random.normal(kws[2 * i + 1], (HIDDEN_DIM,),
                                    dtype=jnp.float32)
        weights.append(w)
        biases.append(b)
        in_dim = HIDDEN_DIM

    # node_tile=8 -> 2 grid steps: exercises the accumulator init/finalize path.
    out = simplified_gcn_forward(x, batch, weights, biases, NUM_GRAPHS,
                                 readout="mean", node_tile=8)
    out = jax.block_until_ready(out)

    ref = _reference_forward(x, batch, weights, biases, NUM_GRAPHS)
    assert out.shape == (NUM_GRAPHS, NUM_LAYERS * HIDDEN_DIM), out.shape
    assert jnp.allclose(out, ref, atol=1e-4, rtol=1e-4), "mismatch vs reference"

    print("KERNEL_OK")
</pallas_src>

<mosaic_0001>
module attributes {stable_mosaic.version = 11 : i64} {
  func.func @_gcn_pool_kernel(%arg0: i32, %arg1: memref<1x1x8xi32, #tpu.memory_space<vmem>>, %arg2: memref<8x8xf32, #tpu.memory_space<vmem>>, %arg3: memref<2x1xf32, #tpu.memory_space<vmem>>, %arg4: memref<8x32xf32, #tpu.memory_space<vmem>>, %arg5: memref<1x32xf32, #tpu.memory_space<vmem>>, %arg6: memref<32x32xf32, #tpu.memory_space<vmem>>, %arg7: memref<1x32xf32, #tpu.memory_space<vmem>>, %arg8: memref<32x32xf32, #tpu.memory_space<vmem>>, %arg9: memref<1x32xf32, #tpu.memory_space<vmem>>, %arg10: memref<2x96xf32, #tpu.memory_space<vmem>>, %arg11: memref<2x8xf32, #tpu.memory_space<vmem>>) attributes {dimension_semantics = [#tpu.dimension_semantics<arbitrary>], iteration_bounds = array<i64: 2>, scalar_prefetch = 0 : i64, scratch_operands = 1 : i64, tpu.core_type = #tpu.core_type<tc>, window_params = [{transform_indices = @transform_0, window_bounds = array<i64: 1, 1, 8>}, {transform_indices = @transform_1, window_bounds = array<i64: 8, 8>}, {pipeline_mode = #tpu.pipeline_mode<synchronous>, transform_indices = @transform_2, window_bounds = array<i64: 2, 1>}, {pipeline_mode = #tpu.pipeline_mode<synchronous>, transform_indices = @transform_3, window_bounds = array<i64: 8, 32>}, {pipeline_mode = #tpu.pipeline_mode<synchronous>, transform_indices = @transform_4, window_bounds = array<i64: 1, 32>}, {pipeline_mode = #tpu.pipeline_mode<synchronous>, transform_indices = @transform_5, window_bounds = array<i64: 32, 32>}, {pipeline_mode = #tpu.pipeline_mode<synchronous>, transform_indices = @transform_6, window_bounds = array<i64: 1, 32>}, {pipeline_mode = #tpu.pipeline_mode<synchronous>, transform_indices = @transform_7, window_bounds = array<i64: 32, 32>}, {pipeline_mode = #tpu.pipeline_mode<synchronous>, transform_indices = @transform_8, window_bounds = array<i64: 1, 32>}, {pipeline_mode = #tpu.pipeline_mode<synchronous>, transform_indices = @transform_9, window_bounds = array<i64: 2, 96>}]} {
    %c0_i32 = arith.constant 0 : i32
    %0 = arith.cmpi eq, %arg0, %c0_i32 : i32
    %1 = arith.extui %0 : i1 to i32
    %c0_i32_0 = arith.constant 0 : i32
    %2 = arith.cmpi ne, %1, %c0_i32_0 : i32
    scf.if %2 {
      %cst_10 = arith.constant 0.000000e+00 : f32
      %18 = vector.broadcast %cst_10 : f32 to vector<2x8xf32>
      %c0_11 = arith.constant 0 : index
      %c0_12 = arith.constant 0 : index
      %19 = vector.load %arg11[%c0_11, %c0_12] : memref<2x8xf32, #tpu.memory_space<vmem>>, vector<2x8xf32>
      tpu.vector_store %arg11[%c0_11, %c0_12], %18 {strides = array<i32>} : memref<2x8xf32, #tpu.memory_space<vmem>>, vector<2x8xf32>,
    } else {
    }
    %c0 = arith.constant 0 : index
    %c0_1 = arith.constant 0 : index
    %c0_2 = arith.constant 0 : index
    %3 = vector.load %arg1[%c0, %c0_1, %c0_2] : memref<1x1x8xi32, #tpu.memory_space<vmem>>, vector<1x1x8xi32>
    %4 = vector.shape_cast %3 : vector<1x1x8xi32> to vector<1x8xi32>
    %5 = tpu.iota {dimensions = array<i32: 0>} : vector<2x8xi32>
    %6 = vector.broadcast %4 : vector<1x8xi32> to vector<2x8xi32>
    %7 = arith.cmpi eq, %5, %6 : vector<2x8xi32>
    %8 = arith.extui %7 : vector<2x8xi1> to vector<2x8xi32>
    %9 = arith.sitofp %8 : vector<2x8xi32> to vector<2x8xf32>
    %c0_3 = arith.constant 0 : index
    %c0_4 = arith.constant 0 : index
    %10 = vector.load %arg11[%c0_3, %c0_4] : memref<2x8xf32, #tpu.memory_space<vmem>>, vector<2x8xf32>
    %c0_5 = arith.constant 0 : index
    %c0_6 = arith.constant 0 : index
    %11 = vector.load %arg2[%c0_5, %c0_6] : memref<8x8xf32, #tpu.memory_space<vmem>>, vector<8x8xf32>
    %cst = arith.constant dense<0.000000e+00> : vector<2x8xf32>
    %12 = tpu.matmul %9, %11, %cst {dimension_numbers = #tpu.dot_dimension_numbers<[1], [0], [0], [1], [0, 0, 1, 1], [], []>} : vector<2x8xf32>, vector<8x8xf32>, vector<2x8xf32> -> vector<2x8xf32>
    %13 = arith.addf %10, %12 : vector<2x8xf32>
    %c0_7 = arith.constant 0 : index
    %c0_8 = arith.constant 0 : index
    %14 = vector.load %arg11[%c0_7, %c0_8] : memref<2x8xf32, #tpu.memory_space<vmem>>, vector<2x8xf32>
    tpu.vector_store %arg11[%c0_7, %c0_8], %13 {strides = array<i32>} : memref<2x8xf32, #tpu.memory_space<vmem>>, vector<2x8xf32>,
    %c1_i32 = arith.constant 1 : i32
    %15 = arith.cmpi eq, %arg0, %c1_i32 : i32
    %16 = arith.extui %15 : i1 to i32
    %c0_i32_9 = arith.constant 0 : i32
    %17 = arith.cmpi ne, %16, %c0_i32_9 : i32
    scf.if %17 {
      %c0_10 = arith.constant 0 : index
      %c0_11 = arith.constant 0 : index
      %18 = vector.load %arg11[%c0_10, %c0_11] : memref<2x8xf32, #tpu.memory_space<vmem>>, vector<2x8xf32>
      %c0_12 = arith.constant 0 : index
      %c0_13 = arith.constant 0 : index
      %19 = vector.load %arg3[%c0_12, %c0_13] : memref<2x1xf32, #tpu.memory_space<vmem>>, vector<2x1xf32>
      %20 = vector.broadcast %19 : vector<2x1xf32> to vector<2x8xf32>
      %21 = arith.mulf %18, %20 : vector<2x8xf32>
      %c0_14 = arith.constant 0 : index
      %c0_15 = arith.constant 0 : index
      %22 = vector.load %arg4[%c0_14, %c0_15] : memref<8x32xf32, #tpu.memory_space<vmem>>, vector<8x32xf32>
      %c0_16 = arith.constant 0 : index
      %c0_17 = arith.constant 0 : index
      %23 = vector.load %arg5[%c0_16, %c0_17] : memref<1x32xf32, #tpu.memory_space<vmem>>, vector<1x32xf32>
      %cst_18 = arith.constant dense<0.000000e+00> : vector<2x32xf32>
      %24 = tpu.matmul %21, %22, %cst_18 {dimension_numbers = #tpu.dot_dimension_numbers<[1], [0], [0], [1], [0, 0, 1, 1], [], []>} : vector<2x8xf32>, vector<8x32xf32>, vector<2x32xf32> -> vector<2x32xf32>
      %25 = vector.broadcast %23 : vector<1x32xf32> to vector<2x32xf32>
      %26 = arith.addf %24, %25 : vector<2x32xf32>
      %c0_19 = arith.constant 0 : index
      %c0_20 = arith.constant 0 : index
      %27 = vector.load %arg10[%c0_19, %c0_20] : memref<2x96xf32, #tpu.memory_space<vmem>>, vector<2x32xf32>
      tpu.vector_store %arg10[%c0_19, %c0_20], %26 {strides = array<i32>} : memref<2x96xf32, #tpu.memory_space<vmem>>, vector<2x32xf32>,
      %c0_21 = arith.constant 0 : index
      %c0_22 = arith.constant 0 : index
      %28 = vector.load %arg6[%c0_21, %c0_22] : memref<32x32xf32, #tpu.memory_space<vmem>>, vector<32x32xf32>
      %c0_23 = arith.constant 0 : index
      %c0_24 = arith.constant 0 : index
      %29 = vector.load %arg7[%c0_23, %c0_24] : memref<1x32xf32, #tpu.memory_space<vmem>>, vector<1x32xf32>
      %cst_25 = arith.constant dense<0.000000e+00> : vector<2x32xf32>
      %30 = tpu.matmul %26, %28, %cst_25 {dimension_numbers = #tpu.dot_dimension_numbers<[1], [0], [0], [1], [0, 0, 1, 1], [], []>} : vector<2x32xf32>, vector<32x32xf32>, vector<2x32xf32> -> vector<2x32xf32>
      %31 = vector.broadcast %29 : vector<1x32xf32> to vector<2x32xf32>
      %32 = arith.addf %30, %31 : vector<2x32xf32>
      %c0_26 = arith.constant 0 : index
      %c32 = arith.constant 32 : index
      %33 = vector.load %arg10[%c0_26, %c32] : memref<2x96xf32, #tpu.memory_space<vmem>>, vector<2x32xf32>
      tpu.vector_store %arg10[%c0_26, %c32], %32 {strides = array<i32>} : memref<2x96xf32, #tpu.memory_space<vmem>>, vector<2x32xf32>,
      %c0_27 = arith.constant 0 : index
      %c0_28 = arith.constant 0 : index
      %34 = vector.load %arg8[%c0_27, %c0_28] : memref<32x32xf32, #tpu.memory_space<vmem>>, vector<32x32xf32>
      %c0_29 = arith.constant 0 : index
      %c0_30 = arith.constant 0 : index
      %35 = vector.load %arg9[%c0_29, %c0_30] : memref<1x32xf32, #tpu.memory_space<vmem>>, vector<1x32xf32>
      %cst_31 = arith.constant dense<0.000000e+00> : vector<2x32xf32>
      %36 = tpu.matmul %32, %34, %cst_31 {dimension_numbers = #tpu.dot_dimension_numbers<[1], [0], [0], [1], [0, 0, 1, 1], [], []>} : vector<2x32xf32>, vector<32x32xf32>, vector<2x32xf32> -> vector<2x32xf32>
      %37 = vector.broadcast %35 : vector<1x32xf32> to vector<2x32xf32>
      %38 = arith.addf %36, %37 : vector<2x32xf32>
      %c0_32 = arith.constant 0 : index
      %c64 = arith.constant 64 : index
      %39 = vector.load %arg10[%c0_32, %c64] : memref<2x96xf32, #tpu.memory_space<vmem>>, vector<2x32xf32>
      tpu.vector_store %arg10[%c0_32, %c64], %38 {strides = array<i32>} : memref<2x96xf32, #tpu.memory_space<vmem>>, vector<2x32xf32>,
    } else {
    }
    return
  }
  func.func @transform_0(%arg0: i32) -> (i32, i32, i32) {
    %c0_i32 = arith.constant 0 : i32
    %c0_i32_0 = arith.constant 0 : i32
    %c0_i32_1 = arith.constant 0 : i32
    return %arg0, %c0_i32, %c0_i32_0 : i32, i32, i32
  }
  func.func @transform_1(%arg0: i32) -> (i32, i32) {
    %c0_i32 = arith.constant 0 : i32
    %c0_i32_0 = arith.constant 0 : i32
    return %arg0, %c0_i32 : i32, i32
  }
  func.func @transform_2(%arg0: i32) -> (i32, i32) {
    %c0_i32 = arith.constant 0 : i32
    %c0_i32_0 = arith.constant 0 : i32
    %c0_i32_1 = arith.constant 0 : i32
    return %c0_i32, %c0_i32_0 : i32, i32
  }
  func.func @transform_3(%arg0: i32) -> (i32, i32) {
    %c0_i32 = arith.constant 0 : i32
    %c0_i32_0 = arith.constant 0 : i32
    %c0_i32_1 = arith.constant 0 : i32
    return %c0_i32, %c0_i32_0 : i32, i32
  }
  func.func @transform_4(%arg0: i32) -> (i32, i32) {
    %c0_i32 = arith.constant 0 : i32
    %c0_i32_0 = arith.constant 0 : i32
    %c0_i32_1 = arith.constant 0 : i32
    return %c0_i32, %c0_i32_0 : i32, i32
  }
  func.func @transform_5(%arg0: i32) -> (i32, i32) {
    %c0_i32 = arith.constant 0 : i32
    %c0_i32_0 = arith.constant 0 : i32
    %c0_i32_1 = arith.constant 0 : i32
    return %c0_i32, %c0_i32_0 : i32, i32
  }
  func.func @transform_6(%arg0: i32) -> (i32, i32) {
    %c0_i32 = arith.constant 0 : i32
    %c0_i32_0 = arith.constant 0 : i32
    %c0_i32_1 = arith.constant 0 : i32
    return %c0_i32, %c0_i32_0 : i32, i32
  }
  func.func @transform_7(%arg0: i32) -> (i32, i32) {
    %c0_i32 = arith.constant 0 : i32
    %c0_i32_0 = arith.constant 0 : i32
    %c0_i32_1 = arith.constant 0 : i32
    return %c0_i32, %c0_i32_0 : i32, i32
  }
  func.func @transform_8(%arg0: i32) -> (i32, i32) {
    %c0_i32 = arith.constant 0 : i32
    %c0_i32_0 = arith.constant 0 : i32
    %c0_i32_1 = arith.constant 0 : i32
    return %c0_i32, %c0_i32_0 : i32, i32
  }
  func.func @transform_9(%arg0: i32) -> (i32, i32) {
    %c0_i32 = arith.constant 0 : i32
    %c0_i32_0 = arith.constant 0 : i32
    %c0_i32_1 = arith.constant 0 : i32
    return %c0_i32, %c0_i32_0 : i32, i32
  }
}

</mosaic_0001>

<bundles_post_ra>
// kernel: tpu_custom_call.1
= control target key start
LH: loop header
LB: loop body
LE: loop exit
PB: predicated region body
PF: predicated region fallthrough
CT: control target
= control target key end

     0   :  { %14 = vsyncpa [#allocation4], 0  ;;  %s908_s0 = inlined_call_operand.vmem [shape: s32[2,1,8], index: 0, kind: input, shape index: {}]   ;;  %s909_s1 = inlined_call_operand.vmem [shape: f32[16,8], index: 1, kind: input, shape index: {}]   ;;  %s910_s2 = inlined_call_operand.vmem [shape: f32[2,1], index: 2, kind: input, shape index: {}]   ;;  %s911_s3 = inlined_call_operand.vmem [shape: f32[8,32], index: 3, kind: input, shape index: {}]   ;;  %s912_s4 = inlined_call_operand.vmem [shape: f32[1,32], index: 4, kind: input, shape index: {}]   ;;  %s913_s5 = inlined_call_operand.hbm [shape: f32[32,32], index: 5, kind: input, shape index: {}]   ;;  %s914_s6 = inlined_call_operand.vmem [shape: f32[1,32], index: 6, kind: input, shape index: {}]   ;;  %s915_s7 = inlined_call_operand.hbm [shape: f32[32,32], index: 7, kind: input, shape index: {}]   ;;  %s916_s8 = inlined_call_operand.vmem [shape: f32[1,32], index: 8, kind: input, shape index: {}]   ;;  %s917_s9 = inlined_call_operand.hbm [shape: f32[2,96], index: 9, kind: output, shape index: {}]  }
   0x1   :  { %15 = vsyncpa [#allocation7], 0 }
   0x2   :  { %16 = vsyncpa [#allocation5], 0  ;;  %s837_s30 = smov 0  }
   0x3 LB: > { %s267_s12 = sshll.u32 %s913_s5, 4  ;;  %s846_s13 = sadd.s32 4294967295, %s775_s30   ;;  %s775_s30 = sphi %s837_s30, %s22_s30   ;;  %s268_s12 = int_to_ptr.hbm [resolvable:$true] %s267_s12 }
   0x4   : > { %p602_p0 = scmp.ge.s32.totalorder %s775_s30, 1  ;;  %p247_p1 = scmp.lt.s32.totalorder %s775_s30, 3 }
   0x5   : > { %p603_p2 = scmp.ne.s32.totalorder %s846_s13, 0  ;;  %p640_p3 = scmp.eq.s32.totalorder %s846_s13, 0 }
   0x6   : > { %p852_p4 = pnand %p602_p0, %p247_p1  ;;  %s777_s15 = smov [#allocation3]  }
   0x7   : > { %s269_s16 = sshll.u32 %s777_s15, 4  ;;  %s284_s19 = sshll.u32 %s915_s7, 4  ;;  %s270_s16 = int_to_ptr.vmem [resolvable:$true] %s269_s16  ;;  %s285_s19 = int_to_ptr.hbm [resolvable:$true] %s284_s19 }
   0x8   : > { %p633_p5 = pneg %p852_p4  ;;  %s778_s20 = smov [#allocation6]  }
   0x9   : > { %s286_s21 = sshll.u32 %s778_s20, 4  ;;  %s779_s22 = smov 128   ;;  %s287_s21 = int_to_ptr.vmem [resolvable:$true] %s286_s21 }
   0xa   : > { %p634_p6 = pnand %p640_p3, %p633_p5  ;;  %s780_s23 = smov 8  }
   0xb   : > { %318 = sbr.rel (%p852_p4) target bundleno = 792 (0x318), region = 56 }
   0xc   : > { %636 = dma.hbm_to_vmem [thread:$0]  (!%p634_p6), %s268_s12, 512, %s270_s16, [#allocation4], %s779_s22, %s779_s22, %s780_s23  }
   0xd   : > { %639 = dma.hbm_to_vmem [thread:$0]  (!%p634_p6), %s285_s19, 512, %s287_s21, [#allocation7], %s779_s22, %s779_s22, %s780_s23  }
  0x10   : > { %762 = dma.done.wait (%p640_p3), [#allocation4], 512  }
  0x11   : > { %764 = vsyncadd (%p640_p3), [#allocation4], 4294966784 }
  0x12   : > { %766 = dma.done.wait (%p640_p3), [#allocation7], 512  }
  0x13   : > { %768 = vsyncadd (%p640_p3), [#allocation7], 4294966784  ;;  %p357_p7 = scmp.lt.s32.totalorder %s846_s13, 1 }
  0x14   : > { %367 = sbr.rel (%p603_p2) target bundleno = 27 (0x1b), region = 68 }
  0x15   : > { %s358_s24 = scalar_select %p357_p7, %s846_s13, 1 }
  0x17   : > { %s359_s27 = scalar_lea.vmem %s908_s0, %s358_s24  ;;  %s609_s28 = sshll.u32 %s358_s24, 3 }
  0x18   : > { %s363_s11 = scalar_lea.vmem %s909_s1, %s609_s28 }
  0x19   : > { %vm368_vm0 = vcmask 58368   ;;  %v781_v0 = vmov 0.0  }
  0x1a   : > { %369 = vst.msk [vmem:[#allocation2] sm:$0x3] %vm368_vm0, %v781_v0 }
  0x1b PF: > { %v378_v1 = vld [vmem:[%s363_s11] sm:$0xff]  ;;  %v371_v2 = vlaneseq  ;;  %vm379_vm1 = vcmask 64512   ;;  %v782_v5 = vmov 0.0   ;;  %vm404_vm3 = vcmask 58368   ;;  %p613_p8 = scmp.ne.s32.totalorder %s846_s13, 1 }
  0x1c   : > { %v664_v3 = vld [vmem:[%s359_s27] ss:$0 sm:$0xff]  ;;  %398 = vmatpush.msra.mxu0 %v378_v1  ;;  %s784_s21 = smov (!%p613_p8), 32   ;;  %s785_s24 = smov (!%p613_p8), 64  }
  0x1d   : > { %v372_v4 = vshrl.u32 %v371_v2, 7 }
  0x1f   : > { %vm374_vm2 = vcmp.eq.s32.totalorder %v372_v4, %v664_v3 }
  0x20   : > { %v611_v6 = vsel %vm374_vm2, 1.0, %v782_v5 }
  0x21   : > { %612 = vmatmul.msk.f32.vlgmr.msra.gmra.mxu0 %vm379_vm1, %v611_v6  ;;  %v377_v7 = vld [vmem:[#allocation2] sm:$0x3] }
  0x9d   : > { %409 = sbr.rel (%p613_p8) target bundleno = 787 (0x313), region = 72 }
  0x9e   : > { %v400_v8 = vpop.f32.mrf.mxu0 }
  0x9f   : > { %v403_v9 = vadd.f32 %v400_v8, %v377_v7 }
  0xa1   : > { %405 = vst.msk [vmem:[#allocation2] sm:$0x3] %vm404_vm3, %v403_v9 }
  0xa2   : > { %v411_v10 = vld [vmem:[%s910_s2] sm:$0x3]  ;;  %v783_v11 = vmov 0   ;;  %v450_v14 = vld [vmem:[#allocation3 + $0x10] sm:$0xff]  ;;  %v449_v18 = vld [vmem:[#allocation3 + $0x8] sm:$0xff]  ;;  %vm446_vm4 = vcmask 254976  }
  0xa3   : > { %665 = vset.pattern.permute.xlu0 %v783_v11  ;;  %v418_v12 = vld [vmem:[%s911_s3] sm:$0xff]  ;;  %v488_v21 = vld [vmem:[#allocation6 + $0x10] sm:$0xff]  ;;  %vm456_vm5 = vcmask 261120   ;;  %v487_v25 = vld [vmem:[#allocation6 + $0x8] sm:$0xff]  ;;  %vm484_vm6 = vcmask 517376   ;;  %vm520_vm7 = vcmask 779776  }
  0xa4   : > { %414 = vperm.xlu0 %665, %v411_v10   ;;  %441 = vmatpush.msra.mxu0 %v418_v12  ;;  %v451_v13 = vld [vmem:[#allocation3 + $0x18] sm:$0xff]  ;;  %v448_v19 = vld [vmem:[#allocation3] sm:$0xff] }
  0xa5   : > { %472 = vmatpush.msra.mxu1 %v451_v13  ;;  %v489_v20 = vld [vmem:[#allocation6 + $0x18] sm:$0xff]  ;;  %v486_v26 = vld [vmem:[#allocation6] sm:$0xff] }
  0xa6   : > { %508 = vmatpush.msra.mxu2 %v489_v20  ;;  %v666_v22 = vld [vmem:[%s912_s4] ss:$0 sm:$0xff] }
  0xa7   : > { %473 = vmatpush.msra.mxu1 %v450_v14  ;;  %v667_v27 = vld [vmem:[%s914_s6] ss:$0 sm:$0xff] }
  0xa8   : > { %v410_v15 = vld [vmem:[#allocation2] sm:$0x3]  ;;  %509 = vmatpush.msra.mxu2 %v488_v21 }
  0xa9   : > { %474 = vmatpush.msra.mxu1 %v449_v18  ;;  %v668_v31 = vld [vmem:[%s916_s8] ss:$0 sm:$0xff] }
  0xaa   : > { %510 = vmatpush.msra.mxu2 %v487_v25 }
  0xab   : > { %475 = vmatpush.msra.mxu1 %v448_v19 }
  0xac   : > { %511 = vmatpush.msra.mxu2 %v486_v26 }
 0x116   : > { %v415_v16 = vpop.permute.xlu0 %414 }
 0x117   : > { %v417_v17 = vmul.f32 %v415_v16, %v410_v15 }
 0x119   : > { %614 = vmatmul.msk.f32.vlgmr.msra.gmra.mxu0 %vm379_vm1, %v417_v17 }
 0x196   : > { %v443_v23 = vpop.f32.mrf.mxu0 }
 0x197   : > { %v444_v24 = vadd.f32 %v666_v22, %v443_v23 }
 0x199   : > { %447 = vst.msk [vmem:[#allocation8] sm:$0x3] %vm446_vm4, %v444_v24  ;;  %615 = vmatmul.msk.f32.vlgmr.msra.gmra.mxu1 %vm456_vm5, %v444_v24 }
 0x216   : > { %v477_v28 = vpop.f32.mrf.mxu1 }
 0x217   : > { %v478_v29 = vadd.f32 %v667_v27, %v477_v28 }
 0x219   : > { %481 = vrot.lane.b32.xlu0 %v478_v29, %s784_s21  ;;  %616 = vmatmul.msk.f32.vlgmr.msra.gmra.mxu2 %vm456_vm5, %v478_v29 }
 0x28b   : > { %v482_v30 = vpop.permute.xlu0 %481 }
 0x28c   : > { %485 = vst.msk [vmem:[#allocation8] sm:$0x3] %vm484_vm6, %v482_v30 }
 0x29c   : > { %v513_v32 = vpop.f32.mrf.mxu2 }
 0x29d   : > { %v514_v33 = vadd.f32 %v668_v31, %v513_v32 }
 0x29f   : > { %517 = vrot.lane.b32.xlu1 %v514_v33, %s785_s24 }
 0x311   : > { %v518_v34 = vpop.permute.xlu1 %517 }
 0x312   : > { %521 = vst.msk [vmem:[#allocation8] sm:$0x3] %vm520_vm7, %v518_v34 }
 0x313 PF: > { %p644_p9 = scmp.eq.s32.totalorder %s846_s13, 1  ;;  %s786_s25 = smov [#allocation8]  }
 0x314   : > { %s528_s26 = sshll.u32 %s786_s25, 4  ;;  %s530_s29 = sshll.u32 %s917_s9, 4  ;;  %s529_s26 = int_to_ptr.vmem [resolvable:$true] %s528_s26  ;;  %s531_s29 = int_to_ptr.hbm [resolvable:$true] %s530_s29 }
 0x315   : > { %630 = dma.vmem_to_hbm [thread:$0]  (%p644_p9), %s529_s26, 32, %s531_s29, [#allocation5]  }
 0x316   : > { %770 = dma.done.wait (%p644_p9), [#allocation5], 32  }
 0x317   : > { %772 = vsyncadd (%p644_p9), [#allocation5], 4294967264 }
 0x318 PF: > { %s22_s30 = sadd.s32 1, %s775_s30  }
 0x319   : > { %p19_p10 = scmp.ge.s32.totalorder %s22_s30, 4  }
 0x31b   :  { %21 = sbr.rel (!%p19_p10) target bundleno = 3 (0x3), region = 103 }
 0x320   :  { %544 = vsyncpa [#allocation4], 1 }
 0x321   :  { %546 = vsyncpa [#allocation4 + $0x1], 1 }
 0x322   :  { %547 = vsyncpa [#allocation7], 1 }
 0x323   :  { %548 = vsyncpa [#allocation5], 1 }
 0x324   :  { %550 = vsyncpa [#allocation5 + $0x1], 1 }

</bundles_post_ra>
